<compile_context>
chip_gen: v7x
topology: tpu7x:2x2x1
jax: 0.10.0
libtpu: 0.0.40
codegen_flags: <defaults>
</compile_context>

<pallas_src>
import functools

import jax
import jax.numpy as jnp
from jax.experimental import pallas as pl
from jax.experimental.pallas import tpu as pltpu


# ----------------------------------------------------------------------------
# Kernel
# ----------------------------------------------------------------------------
def copy_kernel(enc_ref, hid_ref, ctx_ref, word_ref,
                wcT_ref, bc_ref, wau_ref, pbias_ref,
                out_ref, p_ref, *, use_bf16):
    # enc_ref : (S, TB, H)  seq-major slab, native layout (no XLA transpose)
    # hid/ctx/word : (TB, H)
    # wcT_ref : (H, H) == Wc.T (pre-transposed once in the wrapper, resident)
    # bc_ref  : (1, H)
    # wau_ref : (2, H)  row 0 = w_a weight, row 1 = u_a weight
    # pbias_ref : (1, 1) in SMEM == w_a_b + 2*u_a_b
    S, TB, H = enc_ref.shape

    # Flatten (S, TB, H) -> (S*TB, H): layout-preserving because TB % 8 == 0
    # and H is the full last dim.
    enc = enc_ref[...].reshape(S * TB, H)
    hid = hid_ref[...]                                     # (TB, H)
    wcT = wcT_ref[...]                                     # (H, H)

    if use_bf16:
        # Narrow MXU inputs, f32 accumulation (only enabled for large H).
        lhs = enc.astype(jnp.bfloat16)
        rhs = wcT.astype(jnp.bfloat16)
    else:
        lhs, rhs = enc, wcT

    # Linear(H, H) + Hardtanh(-10, 10): enc @ Wc.T + bc, clamped.
    hW = jnp.dot(lhs, rhs, preferred_element_type=jnp.float32)   # (S*TB, H)
    hW = jnp.clip(hW + bc_ref[...], -10.0, 10.0)
    hW = hW.reshape(S, TB, H)

    # bmm(tanh_hTW, hidden.unsqueeze(2)) -> VPU multiply + lane reduce
    # (avoids an M=1 MXU call), then one tiny (S, TB) -> (TB, S) transpose so
    # the store is batch-major with S along lanes.
    red = jnp.sum(hW * hid[None, :, :], axis=-1)           # (S, TB)
    out_ref[...] = red.T.astype(out_ref.dtype)             # (TB, S)

    # p_copy = sigmoid(w_a(ctx) + u_a(hid) + u_a(word)); the two u_a terms are
    # folded into one reduction and all biases into a single SMEM scalar.
    wau = wau_ref[...]                                     # (2, H)
    t_ctx = jnp.sum(ctx_ref[...] * wau[0:1, :], axis=-1, keepdims=True)          # (TB,1)
    t_hw = jnp.sum((hid + word_ref[...]) * wau[1:2, :], axis=-1, keepdims=True)  # (TB,1)
    pbias = pbias_ref[0, 0]                                # scalar from SMEM
    p_ref[...] = jax.nn.sigmoid(t_ctx + t_hw + pbias).astype(p_ref.dtype)


# ----------------------------------------------------------------------------
# Tiling / VMEM budgeting helpers
# ----------------------------------------------------------------------------
def _round_up(x, m):
    return ((x + m - 1) // m) * m


def _vmem_limit_bytes():
    """Generation-aware VMEM limit: ~3/4 of physical capacity, capped at 96 MiB
    (v5e/v6e have 128 MiB, v7x has 64 MiB per TC). Safe fallback if the
    hardware query is unavailable."""
    try:
        cap = int(pltpu.get_tpu_info().vmem_capacity_bytes)
    except Exception:
        cap = 64 << 20
    return min(cap * 3 // 4, 96 << 20)


def _vmem_bytes(tb, S, H, enc_bufs):
    """Account for every pipelined buffer, not just the enc slab."""
    f32 = 4
    enc = enc_bufs * tb * S * H * f32                      # enc slab, N-buffered
    small_in = 2 * (3 * tb * H                             # hid / ctx / word
                    + H * H                                # Wc^T (resident, 2 bufs)
                    + H                                    # copy bias
                    + 2 * H) * f32                         # stacked w_a / u_a rows
    outs = 2 * (tb * S + tb) * f32                         # output + p_copy blocks
    return enc + small_in + outs


def _pick_tb(B, S, H, budget, *, enc_bufs=3, min_steps=4, target_rows=2048):
    """Batch tile: multiple of 8; grow toward ~`target_rows` flattened (TB*S)
    matmul rows while (a) the full VMEM accounting stays within `budget` and
    (b) at least `min_steps` grid steps remain (when B is big enough) so v7x's
    two TensorCores both get work and the DMA pipeline stays deep."""
    b_ceil = _round_up(B, 8)
    step_cap = max(8, ((b_ceil // min_steps) // 8) * 8)
    tb = 8
    while True:
        nxt = tb * 2
        if nxt > b_ceil or nxt > step_cap:
            break
        if tb * S >= target_rows:
            break
        if _vmem_bytes(nxt, S, H, enc_bufs) > budget:
            break
        tb = nxt
    return tb


def _make_enc_spec(S, tb, H, bufs):
    """enc BlockSpec with optional >2-deep pipelining (guarded fallback)."""
    idx = lambda b: (0, b, 0)
    if bufs > 2 and hasattr(pl, "Buffered"):
        try:
            return pl.BlockSpec((S, tb, H), idx, pipeline_mode=pl.Buffered(bufs))
        except TypeError:
            pass
    return pl.BlockSpec((S, tb, H), idx)


# ----------------------------------------------------------------------------
# Wrapper
# ----------------------------------------------------------------------------
def copy_forward(input_embedded_word, hidden, context, encoder_outputs, params,
                 *, tb=None, use_bf16_matmul=None):
    """input_embedded_word: (1,B,H), hidden/context: (B,H),
    encoder_outputs: (S,B,H) (kept seq-major; NOT transposed in the wrapper).
    Returns (output (B,S), p_copy (B,1))."""
    word = jnp.squeeze(input_embedded_word, axis=0)        # (B, H)
    S, B, H = encoder_outputs.shape

    vmem_limit = _vmem_limit_bytes()
    enc_bufs = 3
    if tb is None:
        tb = _pick_tb(B, S, H, budget=vmem_limit * 4 // 5, enc_bufs=enc_bufs)

    B_pad = _round_up(B, tb)
    if B_pad != B:
        pb = B_pad - B
        encoder_outputs = jnp.pad(encoder_outputs, ((0, 0), (0, pb), (0, 0)))
        hidden_k = jnp.pad(hidden, ((0, pb), (0, 0)))
        context_k = jnp.pad(context, ((0, pb), (0, 0)))
        word_k = jnp.pad(word, ((0, pb), (0, 0)))
    else:
        hidden_k, context_k, word_k = hidden, context, word

    n_steps = B_pad // tb
    enc_spec = _make_enc_spec(S, tb, H, enc_bufs if n_steps > enc_bufs else 2)

    if use_bf16_matmul is None:
        use_bf16_matmul = H >= 512   # MXU-narrow path only where it pays off

    # One-time tiny parameter prep (paid once, not per grid step).
    wcT = jnp.asarray(params["copy_w"]).T                  # (H, H) == Wc.T
    bc = jnp.asarray(params["copy_b"]).reshape(1, H)
    wau = jnp.concatenate([jnp.asarray(params["w_a_w"]).reshape(1, H),
                           jnp.asarray(params["u_a_w"]).reshape(1, H)], axis=0)
    pbias = (jnp.asarray(params["w_a_b"]).reshape(())
             + 2.0 * jnp.asarray(params["u_a_b"]).reshape(())).reshape(1, 1)
    # params["v_a_w"], params["v_a_b"] exist but are unused in the reference forward.

    grid_spec = pltpu.PrefetchScalarGridSpec(
        num_scalar_prefetch=0,
        grid=(n_steps,),
        in_specs=[
            enc_spec,                                           # encoder outputs (seq-major)
            pl.BlockSpec((tb, H), lambda b: (b, 0)),            # hidden
            pl.BlockSpec((tb, H), lambda b: (b, 0)),            # context
            pl.BlockSpec((tb, H), lambda b: (b, 0)),            # embedded word
            pl.BlockSpec((H, H), lambda b: (0, 0)),             # Wc^T (DMA'd once, resident)
            pl.BlockSpec((1, H), lambda b: (0, 0)),             # copy bias
            pl.BlockSpec((2, H), lambda b: (0, 0)),             # stacked w_a / u_a weights
            pl.BlockSpec(memory_space=pltpu.MemorySpace.SMEM),  # folded scalar bias
        ],
        out_specs=[
            pl.BlockSpec((tb, S), lambda b: (b, 0)),            # output (B, S), batch-major
            pl.BlockSpec((tb, 1), lambda b: (b, 0)),            # p_copy (B, 1)
        ],
    )

    out, p_copy = pl.pallas_call(
        functools.partial(copy_kernel, use_bf16=use_bf16_matmul),
        out_shape=(jax.ShapeDtypeStruct((B_pad, S), jnp.float32),
                   jax.ShapeDtypeStruct((B_pad, 1), jnp.float32)),
        grid_spec=grid_spec,
        compiler_params=pltpu.CompilerParams(
            dimension_semantics=("parallel",),
            vmem_limit_bytes=vmem_limit),
    )(encoder_outputs, hidden_k, context_k, word_k, wcT, bc, wau, pbias)
    return out[:B], p_copy[:B]


# ----------------------------------------------------------------------------
# Params + reference
# ----------------------------------------------------------------------------
def init_params(key, hidden_size):
    H = hidden_size
    ks = jax.random.split(key, 8)
    bound_h = 1.0 / jnp.sqrt(H)
    u = lambda k, shp, b: jax.random.uniform(k, shp, jnp.float32, -b, b)
    return {
        "copy_w": u(ks[0], (H, H), bound_h),
        "copy_b": u(ks[1], (H,), bound_h),
        "w_a_w": u(ks[2], (1, H), bound_h),
        "w_a_b": u(ks[3], (1,), bound_h),
        "u_a_w": u(ks[4], (1, H), bound_h),
        "u_a_b": u(ks[5], (1,), bound_h),
        "v_a_w": u(ks[6], (1, H), bound_h),   # defined but unused (matches reference)
        "v_a_b": u(ks[7], (1,), bound_h),
    }


def reference_forward(input_embedded_word, hidden, context, encoder_outputs, p):
    """Plain-JAX mirror of the PyTorch forward for verification."""
    word = jnp.squeeze(input_embedded_word, axis=0)
    lin = lambda x, w, b: x @ w.T + b
    p_copy = jax.nn.sigmoid(lin(context, p["w_a_w"], p["w_a_b"])
                            + lin(hidden, p["u_a_w"], p["u_a_b"])
                            + lin(word, p["u_a_w"], p["u_a_b"]))
    hT = jnp.transpose(encoder_outputs, (1, 0, 2))               # (B, S, H)
    tanh_hTW = jnp.clip(hT @ p["copy_w"].T + p["copy_b"], -10.0, 10.0)
    out = jnp.einsum("bsh,bh->bs", tanh_hTW, hidden)
    return out, p_copy


if __name__ == "__main__":
    B, S, H = 2, 8, 32
    key = jax.random.PRNGKey(0)
    k_p, k1, k2, k3, k4 = jax.random.split(key, 5)

    params = init_params(k_p, H)
    input_embedded_word = jax.random.normal(k1, (1, B, H), jnp.float32)
    hidden = jax.random.normal(k2, (B, H), jnp.float32)
    context = jax.random.normal(k3, (B, H), jnp.float32)
    encoder_outputs = jax.random.normal(k4, (S, B, H), jnp.float32)

    out, p_copy = copy_forward(input_embedded_word, hidden, context,
                               encoder_outputs, params)
    jax.block_until_ready((out, p_copy))

    out_ref, p_ref = reference_forward(input_embedded_word, hidden, context,
                                       encoder_outputs, params)
    assert out.shape == (B, S) and p_copy.shape == (B, 1)
    assert jnp.allclose(out, out_ref, atol=1e-4, rtol=1e-4)
    assert jnp.allclose(p_copy, p_ref, atol=1e-5, rtol=1e-5)
    print("KERNEL_OK")
</pallas_src>

<mosaic_0001>
module attributes {stable_mosaic.version = 11 : i64} {
  func.func @copy_kernel(%arg0: i32, %arg1: memref<8x8x32xf32, #tpu.memory_space<vmem>>, %arg2: memref<8x32xf32, #tpu.memory_space<vmem>>, %arg3: memref<8x32xf32, #tpu.memory_space<vmem>>, %arg4: memref<8x32xf32, #tpu.memory_space<vmem>>, %arg5: memref<32x32xf32, #tpu.memory_space<vmem>>, %arg6: memref<1x32xf32, #tpu.memory_space<vmem>>, %arg7: memref<2x32xf32, #tpu.memory_space<vmem>>, %arg8: memref<1x1xf32, #tpu.memory_space<smem>>, %arg9: memref<8x8xf32, #tpu.memory_space<vmem>>, %arg10: memref<8x1xf32, #tpu.memory_space<vmem>>) attributes {dimension_semantics = [#tpu.dimension_semantics<parallel>], iteration_bounds = array<i64: 1>, scalar_prefetch = 0 : i64, scratch_operands = 0 : i64, tpu.core_type = #tpu.core_type<tc>, window_params = [{transform_indices = @transform_0, window_bounds = array<i64: 8, 8, 32>}, {transform_indices = @transform_1, window_bounds = array<i64: 8, 32>}, {transform_indices = @transform_2, window_bounds = array<i64: 8, 32>}, {transform_indices = @transform_3, window_bounds = array<i64: 8, 32>}, {pipeline_mode = #tpu.pipeline_mode<synchronous>, transform_indices = @transform_4, window_bounds = array<i64: 32, 32>}, {pipeline_mode = #tpu.pipeline_mode<synchronous>, transform_indices = @transform_5, window_bounds = array<i64: 1, 32>}, {pipeline_mode = #tpu.pipeline_mode<synchronous>, transform_indices = @transform_6, window_bounds = array<i64: 2, 32>}, {transform_indices = @transform_7, window_bounds = array<i64: 1, 1>}, {transform_indices = @transform_8, window_bounds = array<i64: 8, 8>}, {transform_indices = @transform_9, window_bounds = array<i64: 8, 1>}]} {
    %c0 = arith.constant 0 : index
    %c0_0 = arith.constant 0 : index
    %c0_1 = arith.constant 0 : index
    %0 = vector.load %arg1[%c0, %c0_0, %c0_1] : memref<8x8x32xf32, #tpu.memory_space<vmem>>, vector<8x8x32xf32>
    %1 = vector.shape_cast %0 : vector<8x8x32xf32> to vector<64x32xf32>
    %c0_2 = arith.constant 0 : index
    %c0_3 = arith.constant 0 : index
    %2 = vector.load %arg2[%c0_2, %c0_3] : memref<8x32xf32, #tpu.memory_space<vmem>>, vector<8x32xf32>
    %c0_4 = arith.constant 0 : index
    %c0_5 = arith.constant 0 : index
    %3 = vector.load %arg5[%c0_4, %c0_5] : memref<32x32xf32, #tpu.memory_space<vmem>>, vector<32x32xf32>
    %cst = arith.constant dense<0.000000e+00> : vector<64x32xf32>
    %4 = tpu.matmul %1, %3, %cst {dimension_numbers = #tpu.dot_dimension_numbers<[1], [0], [0], [1], [0, 0, 1, 1], [], []>} : vector<64x32xf32>, vector<32x32xf32>, vector<64x32xf32> -> vector<64x32xf32>
    %c0_6 = arith.constant 0 : index
    %c0_7 = arith.constant 0 : index
    %5 = vector.load %arg6[%c0_6, %c0_7] : memref<1x32xf32, #tpu.memory_space<vmem>>, vector<1x32xf32>
    %6 = vector.broadcast %5 : vector<1x32xf32> to vector<64x32xf32>
    %7 = arith.addf %4, %6 : vector<64x32xf32>
    %cst_8 = arith.constant -1.000000e+01 : f32
    %cst_9 = arith.constant 1.000000e+01 : f32
    %8 = vector.broadcast %cst_8 : f32 to vector<64x32xf32>
    %9 = arith.maximumf %8, %7 : vector<64x32xf32>
    %10 = vector.broadcast %cst_9 : f32 to vector<64x32xf32>
    %11 = arith.minimumf %10, %9 : vector<64x32xf32>
    %12 = vector.shape_cast %11 : vector<64x32xf32> to vector<8x8x32xf32>
    %13 = vector.shape_cast %2 : vector<8x32xf32> to vector<1x8x32xf32>
    %14 = vector.broadcast %13 : vector<1x8x32xf32> to vector<8x8x32xf32>
    %15 = arith.mulf %12, %14 : vector<8x8x32xf32>
    %cst_10 = arith.constant dense<0.000000e+00> : vector<8x8xf32>
    %16 = vector.multi_reduction <add>, %15, %cst_10 [2] : vector<8x8x32xf32> to vector<8x8xf32>
    %17 = tpu.transpose %16, [1, 0] : vector<8x8xf32> -> vector<8x8xf32>
    %c0_11 = arith.constant 0 : index
    %c0_12 = arith.constant 0 : index
    %18 = vector.load %arg9[%c0_11, %c0_12] : memref<8x8xf32, #tpu.memory_space<vmem>>, vector<8x8xf32>
    tpu.vector_store %arg9[%c0_11, %c0_12], %17 {strides = array<i32>} : memref<8x8xf32, #tpu.memory_space<vmem>>, vector<8x8xf32>,
    %c0_13 = arith.constant 0 : index
    %c0_14 = arith.constant 0 : index
    %19 = vector.load %arg7[%c0_13, %c0_14] : memref<2x32xf32, #tpu.memory_space<vmem>>, vector<2x32xf32>
    %c0_15 = arith.constant 0 : index
    %c0_16 = arith.constant 0 : index
    %20 = vector.load %arg3[%c0_15, %c0_16] : memref<8x32xf32, #tpu.memory_space<vmem>>, vector<8x32xf32>
    %21 = vector.extract_strided_slice %19 {offsets = [0, 0], sizes = [1, 32], strides = [1, 1]} : vector<2x32xf32> to vector<1x32xf32>
    %22 = vector.broadcast %21 : vector<1x32xf32> to vector<8x32xf32>
    %23 = arith.mulf %20, %22 : vector<8x32xf32>
    %cst_17 = arith.constant dense<0.000000e+00> : vector<8xf32>
    %24 = vector.multi_reduction <add>, %23, %cst_17 [1] : vector<8x32xf32> to vector<8xf32>
    %25 = vector.shape_cast %24 : vector<8xf32> to vector<8x1xf32>
    %c0_18 = arith.constant 0 : index
    %c0_19 = arith.constant 0 : index
    %26 = vector.load %arg4[%c0_18, %c0_19] : memref<8x32xf32, #tpu.memory_space<vmem>>, vector<8x32xf32>
    %27 = arith.addf %2, %26 : vector<8x32xf32>
    %28 = vector.extract_strided_slice %19 {offsets = [1, 0], sizes = [1, 32], strides = [1, 1]} : vector<2x32xf32> to vector<1x32xf32>
    %29 = vector.broadcast %28 : vector<1x32xf32> to vector<8x32xf32>
    %30 = arith.mulf %27, %29 : vector<8x32xf32>
    %cst_20 = arith.constant dense<0.000000e+00> : vector<8xf32>
    %31 = vector.multi_reduction <add>, %30, %cst_20 [1] : vector<8x32xf32> to vector<8xf32>
    %32 = vector.shape_cast %31 : vector<8xf32> to vector<8x1xf32>
    %c0_21 = arith.constant 0 : index
    %c0_22 = arith.constant 0 : index
    %33 = memref.load %arg8[%c0_21, %c0_22] : memref<1x1xf32, #tpu.memory_space<smem>>
    %34 = arith.addf %25, %32 : vector<8x1xf32>
    %35 = vector.broadcast %33 : f32 to vector<8x1xf32>
    %36 = arith.addf %34, %35 : vector<8x1xf32>
    %37 = arith.negf %36 : vector<8x1xf32>
    %38 = math.exp %37 : vector<8x1xf32>
    %cst_23 = arith.constant 1.000000e+00 : f32
    %39 = vector.broadcast %cst_23 : f32 to vector<8x1xf32>
    %40 = arith.addf %39, %38 : vector<8x1xf32>
    %41 = arith.divf %39, %40 : vector<8x1xf32>
    %c0_24 = arith.constant 0 : index
    %c0_25 = arith.constant 0 : index
    %42 = vector.load %arg10[%c0_24, %c0_25] : memref<8x1xf32, #tpu.memory_space<vmem>>, vector<8x1xf32>
    tpu.vector_store %arg10[%c0_24, %c0_25], %41 {strides = array<i32>} : memref<8x1xf32, #tpu.memory_space<vmem>>, vector<8x1xf32>,
    return
  }
  func.func @transform_0(%arg0: i32) -> (i32, i32, i32) {
    %c0_i32 = arith.constant 0 : i32
    %c0_i32_0 = arith.constant 0 : i32
    %c0_i32_1 = arith.constant 0 : i32
    return %c0_i32, %arg0, %c0_i32_0 : i32, i32, i32
  }
  func.func @transform_1(%arg0: i32) -> (i32, i32) {
    %c0_i32 = arith.constant 0 : i32
    %c0_i32_0 = arith.constant 0 : i32
    return %arg0, %c0_i32 : i32, i32
  }
  func.func @transform_2(%arg0: i32) -> (i32, i32) {
    %c0_i32 = arith.constant 0 : i32
    %c0_i32_0 = arith.constant 0 : i32
    return %arg0, %c0_i32 : i32, i32
  }
  func.func @transform_3(%arg0: i32) -> (i32, i32) {
    %c0_i32 = arith.constant 0 : i32
    %c0_i32_0 = arith.constant 0 : i32
    return %arg0, %c0_i32 : i32, i32
  }
  func.func @transform_4(%arg0: i32) -> (i32, i32) {
    %c0_i32 = arith.constant 0 : i32
    %c0_i32_0 = arith.constant 0 : i32
    %c0_i32_1 = arith.constant 0 : i32
    return %c0_i32, %c0_i32_0 : i32, i32
  }
  func.func @transform_5(%arg0: i32) -> (i32, i32) {
    %c0_i32 = arith.constant 0 : i32
    %c0_i32_0 = arith.constant 0 : i32
    %c0_i32_1 = arith.constant 0 : i32
    return %c0_i32, %c0_i32_0 : i32, i32
  }
  func.func @transform_6(%arg0: i32) -> (i32, i32) {
    %c0_i32 = arith.constant 0 : i32
    %c0_i32_0 = arith.constant 0 : i32
    %c0_i32_1 = arith.constant 0 : i32
    return %c0_i32, %c0_i32_0 : i32, i32
  }
  func.func @transform_7(%arg0: i32) -> (i32, i32) {
    %c0_i32 = arith.constant 0 : i32
    %c0_i32_0 = arith.constant 0 : i32
    %c0_i32_1 = arith.constant 0 : i32
    return %c0_i32, %c0_i32_0 : i32, i32
  }
  func.func @transform_8(%arg0: i32) -> (i32, i32) {
    %c0_i32 = arith.constant 0 : i32
    %c0_i32_0 = arith.constant 0 : i32
    return %arg0, %c0_i32 : i32, i32
  }
  func.func @transform_9(%arg0: i32) -> (i32, i32) {
    %c0_i32 = arith.constant 0 : i32
    %c0_i32_0 = arith.constant 0 : i32
    return %arg0, %c0_i32 : i32, i32
  }
}

</mosaic_0001>

<bundles_post_ra>
// kernel: tpu_custom_call.1
= control target key start
LH: loop header
LB: loop body
LE: loop exit
PB: predicated region body
PF: predicated region fallthrough
CT: control target
= control target key end

     0   :  { %16 = vsyncpa [#allocation4], 0  ;;  %s798_s0 = inlined_call_operand.hbm [shape: f32[8,8,32], index: 0, kind: input, shape index: {}]   ;;  %s799_s1 = inlined_call_operand.hbm [shape: f32[8,32], index: 1, kind: input, shape index: {}]   ;;  %s800_s2 = inlined_call_operand.vmem [shape: f32[8,32], index: 2, kind: input, shape index: {}]   ;;  %s801_s3 = inlined_call_operand.hbm [shape: f32[8,32], index: 3, kind: input, shape index: {}]   ;;  %s802_s4 = inlined_call_operand.hbm [shape: f32[32,32], index: 4, kind: input, shape index: {}]   ;;  %s803_s5 = inlined_call_operand.vmem [shape: f32[1,32], index: 5, kind: input, shape index: {}]   ;;  %s804_s6 = inlined_call_operand.vmem [shape: f32[2,32], index: 6, kind: input, shape index: {}]   ;;  %s805_s7 = inlined_call_operand.<no memory space> [shape: f32[1,1], index: 7, kind: input, shape index: {}]   ;;  %s806_s8 = inlined_call_operand.hbm [shape: f32[8,8], index: 8, kind: output, shape index: {0}]   ;;  %s807_s9 = inlined_call_operand.vmem [shape: f32[8,1], index: 9, kind: output, shape index: {1}]  }
   0x1   :  { %17 = vsyncpa [#allocation7], 0 }
   0x2   :  { %18 = vsyncpa [#allocation10], 0 }
   0x3   :  { %19 = vsyncpa [#allocation5], 0  ;;  %s618_s30 = smov [#allocation6]   ;;  %s619_s11 = smov [#allocation3]  }
   0x4   :  { %s38_s10 = sshll.u32 %s618_s30, 4  ;;  %s25_s12 = sshll.u32 %s619_s11, 4  ;;  %s39_s10 = int_to_ptr.vmem [resolvable:$true] %s38_s10  ;;  %s675_s12 = int_to_ptr.vmem [resolvable:$true] %s25_s12 }
   0x5   :  { %s500_s15 = scalar_lea.hbm %s799_s1, 128 }
   0x6   :  { %p501_p0 = scmp.ne.s32.totalorder %s799_s1, %s500_s15  ;;  %p504_p1 = scmp.lt.u32.totalorder %s500_s15, %s799_s1 }
   0x8   :  { %p506_p2 = pnand %p504_p1, %p501_p0 }
   0xa   :  { %509 = shalt.err (!%p506_p2)
}
   0xb   :  { %s510_s20 = scalar_lea.vmem %s39_s10, 128  ;;  %p515_p4 = scmp.lt.s32.totalorder %s39_s10, %s39_s10 }
   0xc   :  { %p511_p3 = scmp.ne.s32.totalorder %s39_s10, %s510_s20  ;;  %p516_p5 = scmp.lt.s32.totalorder %s510_s20, %s510_s20 }
   0xe   :  { %p517_p6 = por %p516_p5, %p515_p4 }
  0x10   :  { %p518_p7 = pnand %p517_p6, %p511_p3 }
  0x12   :  { %521 = shalt.err (!%p518_p7)
}
  0x13   :  { %41 = dma.hbm_to_vmem [thread:$0]  %s799_s1, 128, %s39_s10, [#allocation7]  }
  0x14   :  { %s522_s25 = scalar_lea.hbm %s798_s0, 1024 }
  0x15   :  { %p523_p8 = scmp.ne.s32.totalorder %s798_s0, %s522_s25  ;;  %p526_p9 = scmp.lt.u32.totalorder %s522_s25, %s798_s0 }
  0x17   :  { %p528_p10 = pnand %p526_p9, %p523_p8 }
  0x19   :  { %531 = shalt.err (!%p528_p10)
}
  0x1a   :  { %s532_s30 = scalar_lea.vmem %s675_s12, 1024  ;;  %p537_p12 = scmp.lt.s32.totalorder %s675_s12, %s675_s12 }
  0x1b   :  { %p533_p11 = scmp.ne.s32.totalorder %s675_s12, %s532_s30  ;;  %p538_p13 = scmp.lt.s32.totalorder %s532_s30, %s532_s30 }
  0x1d   :  { %p539_p0 = por %p538_p13, %p537_p12 }
  0x1f   :  { %p540_p1 = pnand %p539_p0, %p533_p11 }
  0x21   :  { %543 = shalt.err (!%p540_p1)
}
  0x22   :  { %s620_s1 = smov 128   ;;  %s621_s10 = smov 8  }
  0x23   :  { %31 = dma.hbm_to_vmem [thread:$0]  %s798_s0, 1024, %s675_s12, [#allocation4], %s620_s1, %s620_s1, %s621_s10  }
  0x24   :  { %s622_s14 = smov [#allocation8]   ;;  %s623_s16 = smov [#allocation9]  }
  0x25   :  { %s50_s15 = sshll.u32 %s622_s14, 4  ;;  %s59_s17 = sshll.u32 %s623_s16, 4  ;;  %s51_s15 = int_to_ptr.vmem [resolvable:$true] %s50_s15  ;;  %s709_s17 = int_to_ptr.vmem [resolvable:$true] %s59_s17 }
  0x26   :  { %s544_s20 = scalar_lea.hbm %s801_s3, 128 }
  0x27   :  { %p545_p2 = scmp.ne.s32.totalorder %s801_s3, %s544_s20  ;;  %p548_p3 = scmp.lt.u32.totalorder %s544_s20, %s801_s3 }
  0x29   :  { %p550_p4 = pnand %p548_p3, %p545_p2 }
  0x2b   :  { %553 = shalt.err (!%p550_p4)
}
  0x2c   :  { %s554_s0 = scalar_lea.vmem %s51_s15, 128  ;;  %p559_p6 = scmp.lt.s32.totalorder %s51_s15, %s51_s15 }
  0x2d   :  { %p555_p5 = scmp.ne.s32.totalorder %s51_s15, %s554_s0  ;;  %p560_p7 = scmp.lt.s32.totalorder %s554_s0, %s554_s0 }
  0x2f   :  { %p561_p8 = por %p560_p7, %p559_p6 }
  0x31   :  { %p562_p9 = pnand %p561_p8, %p555_p5 }
  0x33   :  { %565 = shalt.err (!%p562_p9)
}
  0x34   :  { %53 = dma.hbm_to_vmem [thread:$0]  %s801_s3, 128, %s51_s15, [#allocation7]  }
  0x35   :  { %s566_s28 = scalar_lea.hbm %s802_s4, 512 }
  0x36   :  { %p567_p10 = scmp.ne.s32.totalorder %s802_s4, %s566_s28  ;;  %p570_p11 = scmp.lt.u32.totalorder %s566_s28, %s802_s4 }
  0x38   :  { %p572_p12 = pnand %p570_p11, %p567_p10 }
  0x3a   :  { %575 = shalt.err (!%p572_p12)
}
  0x3b   :  { %s576_s14 = scalar_lea.vmem %s709_s17, 512  ;;  %p581_p0 = scmp.lt.s32.totalorder %s709_s17, %s709_s17 }
  0x3c   :  { %p577_p13 = scmp.ne.s32.totalorder %s709_s17, %s576_s14  ;;  %p582_p1 = scmp.lt.s32.totalorder %s576_s14, %s576_s14 }
  0x3e   :  { %p583_p2 = por %p582_p1, %p581_p0 }
  0x40   :  { %p584_p3 = pnand %p583_p2, %p577_p13 }
  0x42   :  { %587 = shalt.err (!%p584_p3)
}
  0x43   :  { %65 = dma.hbm_to_vmem [thread:$0]  %s802_s4, 512, %s709_s17, [#allocation10], %s620_s1, %s620_s1, %s621_s10  }
  0x44   :  { %610 = dma.done.wait [#allocation4], 1024  }
  0x45   :  { %611 = vsyncadd [#allocation4], 4294966272 }
  0x46   :  { %612 = dma.done.wait [#allocation7], 256  }
  0x47   :  { %613 = vsyncadd [#allocation7], 4294967040 }
  0x48   :  { %614 = dma.done.wait [#allocation10], 512  }
  0x49   :  { %615 = vsyncadd [#allocation10], 4294966784  ;;  %vm104_vm0 = vcmask 261120   ;;  %v93_v0 = vld [vmem:[#allocation9] sm:$0xff]  ;;  %v94_v1 = vld [vmem:[#allocation9 + $0x8] sm:$0xff]  ;;  %v290_v14 = vlaneseq  ;;  %vm324_vm1 = vcmask 1041409  }
  0x4a   :  { %v95_v2 = vld [vmem:[#allocation9 + $0x10] sm:$0xff]  ;;  %v476_v3 = vpack.c.bf16 %v94_v1, %v93_v0  ;;  %v96_v4 = vld [vmem:[#allocation9 + $0x18] sm:$0xff]  ;;  %v86_v10 = vld [vmem:[#allocation3 + $0x10] sm:$0xff]  ;;  %vm326_vm2 = vcmask 1042434   ;;  %vm328_vm3 = vcmask 1043459   ;;  %vm330_vm4 = vcmask 1044484  }
  0x4b   :  { %v84_v5 = vld [vmem:[#allocation3] sm:$0xff]  ;;  %v480_v6 = vpack.c.bf16 %v96_v4, %v95_v2  ;;  %v85_v8 = vld [vmem:[#allocation3 + $0x8] sm:$0xff]  ;;  %v90_v11 = vld [vmem:[#allocation3 + $0x30] sm:$0xff]  ;;  %v291_v15 = vand.u32 127, %v290_v14  ;;  %v293_v16 = vshrl.u32 %v290_v14, 7  ;;  %vm332_vm5 = vcmask 1045509  }
  0x4c   :  { %464 = vmatprep.mubr.msk.f32.mxu0 %vm104_vm0, %v84_v5  ;;  %477 = vmatprep.subr.bf16.mxu0 %v476_v3  ;;  %v88_v7 = vld [vmem:[#allocation3 + $0x20] sm:$0xff]  ;;  %v89_v9 = vld [vmem:[#allocation3 + $0x28] sm:$0xff]  ;;  %v87_v12 = vld [vmem:[#allocation3 + $0x18] sm:$0xff]  ;;  %vm334_vm6 = vcmask 1046534   ;;  %vm336_vm7 = vcmask 1047559   ;;  %vm403_vm8 = vcmask 7168  }
  0x4d   :  { %484 = vmatprep.subr.bf16.mxu1 %v476_v3  ;;  %479 = vmatpush3.bf16.msra.mxu0 %v476_v3  ;;  %v91_v13 = vld [vmem:[#allocation3 + $0x38] sm:$0xff]  ;;  %v751_v17 = vsub.s32 %v291_v15, %v293_v16  ;;  %v426_v18 = vld [vmem:[%s803_s5] ss:$0 sm:$0xff]  ;;  %v377_v46 = vsub.s32 0, %v293_v16  ;;  %v387_v55 = vsub.s32 1, %v293_v16  ;;  %v383_v57 = vld [vmem:[#allocation8] sm:$0xff] }
  0x4e   :  { %486 = vmatpush3.bf16.msra.mxu1 %v476_v3  ;;  %481 = vmatprep.subr.bf16.mxu0 %v480_v6  ;;  %v92_v25 = vld [vmem:[#allocation6] sm:$0xff]  ;;  %s624_s20 = smov [#allocation11]   ;;  %vm371_vm9 = vcmask 64512  }
  0x4f   :  { %485 = vmatprep.subr.bf16.mxu1 %v480_v6  ;;  %470 = vmatprep.mubr.msk.f32.mxu1 %vm104_vm0, %v88_v7  ;;  %v373_v48 = vld [vmem:[%s804_s6] sm:$0x3]  ;;  %v384_v63 = vadd.f32 %v383_v57, %v92_v25  ;;  %s411_s21 = sshll.u32 %s624_s20, 4  ;;  %s412_s21 = int_to_ptr.vmem [resolvable:$true] %s411_s21 }
  0x50   :  { %v378_v56 = vrot.slane %v373_v48, %v377_v46  ;;  %v374_v58 = vld [vmem:[%s800_s2] sm:$0xff]  ;;  %v388_v0 = vrot.slane %v373_v48, %v387_v55  ;;  %p593_p5 = scmp.lt.s32.totalorder %s412_s21, %s412_s21 }
  0x51   :  { %483 = vmatpush3.bf16.msra.mxu0 %v480_v6 }
  0x52   :  { %487 = vmatpush3.bf16.msra.mxu1 %v480_v6  ;;  %v379_v1 = vmul.f32 %v378_v56, %v374_v58  ;;  %v389_v4 = vmul.f32 %v388_v0, %v384_v63 }
  0x54   :  { %465 = vmatmul.mubr.msk.f32.vlgmr.msra.gmra.mrb[0].mxu0 %vm104_vm0, %v85_v8  ;;  %v380_v5 = vsel %vm104_vm0, %v379_v1, 0.0  ;;  %v390_v7 = vsel %vm104_vm0, %v389_v4, 0.0 }
  0x55   :  { %471 = vmatmul.mubr.msk.f32.vlgmr.msra.gmra.mrb[0].mxu1 %vm104_vm0, %v89_v9  ;;  %467 = vmatprep.mubr.msk.f32.mxu0 %vm104_vm0, %v86_v10 }
  0x56   :  { %473 = vmatprep.mubr.msk.f32.mxu1 %vm104_vm0, %v90_v11 }
  0x58   :  { %468 = vmatmul.mubr.msk.f32.gmra.mrb[2].mxu0 %vm104_vm0, %v87_v12 }
  0x59   :  { %474 = vmatmul.mubr.msk.f32.gmra.mrb[2].mxu1 %vm104_vm0, %v91_v13 }
 0x127   :  { %v466_v19 = vpop.f32.mrb[0].mxu0 }
 0x128   :  { %v472_v20 = vpop.f32.mrb[0].mxu1  ;;  %v201_v21 = vadd.f32 %v466_v19, %v426_v18  ;;  %v195_v22 = vpop.f32.mrb[1].mxu0 }
 0x129   :  { %v215_v23 = vpop.f32.mrb[1].mxu1  ;;  %v196_v24 = vadd.f32 %v426_v18, %v195_v22  ;;  %v221_v37 = vadd.f32 %v472_v20, %v426_v18 }
 0x12a   :  { %v216_v26 = vadd.f32 %v426_v18, %v215_v23  ;;  %v436_v27 = vclamps-f32 %v201_v21, 10.0 }
 0x12b   :  { %v435_v28 = vclamps-f32 %v196_v24, 10.0  ;;  %v469_v29 = vpop.f32.mrb[2].mxu0  ;;  %v440_v47 = vclamps-f32 %v221_v37, 10.0 }
 0x12c   :  { %v475_v30 = vpop.f32.mrb[2].mxu1  ;;  %v211_v31 = vadd.f32 %v469_v29, %v426_v18  ;;  %v205_v32 = vpop.f32.mrb[3].mxu0  ;;  %v251_v33 = vmul.f32 %v436_v27, %v92_v25  ;;  %v439_v34 = vclamps-f32 %v216_v26, 10.0 }
 0x12d   :  { %v225_v35 = vpop.f32.mrb[3].mxu1  ;;  %v206_v36 = vadd.f32 %v426_v18, %v205_v32  ;;  %v250_v41 = vmul.f32 %v435_v28, %v92_v25  ;;  %v231_v49 = vadd.f32 %v475_v30, %v426_v18  ;;  %v255_v61 = vmul.f32 %v440_v47, %v92_v25 }
 0x12e   :  { %v226_v38 = vadd.f32 %v426_v18, %v225_v35  ;;  %v438_v39 = vclamps-f32 %v211_v31, 10.0  ;;  %v261_v40 = vsel %vm104_vm0, %v251_v33, 0.0  ;;  %v254_v45 = vmul.f32 %v439_v34, %v92_v25 }
 0x12f   :  { %v437_v42 = vclamps-f32 %v206_v36, 10.0  ;;  %262 = vadd.xlane.f32.xlu0 %v261_v40  ;;  %v258_v51 = vsel %vm104_vm0, %v250_v41, 0.0  ;;  %v442_v59 = vclamps-f32 %v231_v49, 10.0  ;;  %v273_v2 = vsel %vm104_vm0, %v255_v61, 0.0 }
 0x130   :  { %v253_v43 = vmul.f32 %v438_v39, %v92_v25  ;;  %v441_v44 = vclamps-f32 %v226_v38, 10.0  ;;  %v270_v53 = vsel %vm104_vm0, %v254_v45, 0.0  ;;  %v395_v34 = vstv %s805_s7  ;;  %s588_s7 = scalar_lea.vmem %s412_s21, 128 }
 0x131   :  { %v252_v52 = vmul.f32 %v437_v42, %v92_v25  ;;  %v257_v3 = vmul.f32 %v442_v59, %v92_v25  ;;  %p589_p4 = scmp.ne.s32.totalorder %s412_s21, %s588_s7  ;;  %p594_p6 = scmp.lt.s32.totalorder %s588_s7, %s588_s7 }
 0x132   :  { %v267_v50 = vsel %vm104_vm0, %v253_v43, 0.0  ;;  %v256_v54 = vmul.f32 %v441_v44, %v92_v25 }
 0x133   :  { %268 = vadd.xlane.f32.xlu1 %v267_v50  ;;  %259 = vadd.xlane.f32.xlu0 %v258_v51  ;;  %v264_v60 = vsel %vm104_vm0, %v252_v52, 0.0  ;;  %v279_v6 = vsel %vm104_vm0, %v257_v3, 0.0  ;;  %p595_p7 = por %p594_p6, %p593_p5 }
 0x134   :  { %v276_v62 = vsel %vm104_vm0, %v256_v54, 0.0 }
 0x135   :  { %p596_p8 = pnand %p595_p7, %p589_p4 }
 0x137   :  { %265 = vadd.xlane.f32.xlu1 %v264_v60  ;;  %271 = vadd.xlane.f32.xlu0 %v270_v53 }
 0x13b   :  { %274 = vadd.xlane.f32.xlu1 %v273_v2  ;;  %277 = vadd.xlane.f32.xlu0 %v276_v62 }
 0x13f   :  { %280 = vadd.xlane.f32.xlu1 %v279_v6  ;;  %381 = vadd.xlane.f32.xlu0 %v380_v5 }
 0x143   :  { %391 = vadd.xlane.f32.xlu1 %v390_v7 }
 0x1bc   :  { %v263_v8 = vpop.xlane.xlu0 %262 }
 0x1bd   :  { %v299_v12 = vrot.slane %v263_v8, %v751_v17 }
 0x1c0   :  { %v269_v9 = vpop.xlane.xlu1 %268  ;;  %v260_v10 = vpop.xlane.xlu0 %259 }
 0x1c1   :  { %v295_v11 = vrot.slane %v260_v10, %v751_v17  ;;  %v307_v18 = vrot.slane %v269_v9, %v751_v17 }
 0x1c3   :  { %v325_v19 = vsel %vm324_vm1, %v299_v12, %v295_v11 }
 0x1c4   :  { %v266_v13 = vpop.xlane.xlu1 %265  ;;  %v272_v14 = vpop.xlane.xlu0 %271 }
 0x1c5   :  { %v303_v15 = vrot.slane %v266_v13, %v751_v17  ;;  %v311_v16 = vrot.slane %v272_v14, %v751_v17 }
 0x1c7   :  { %v327_v20 = vsel %vm326_vm2, %v303_v15, %v325_v19 }
 0x1c8   :  { %v329_v21 = vsel %vm328_vm3, %v307_v18, %v327_v20  ;;  %v275_v22 = vpop.xlane.xlu1 %274  ;;  %v278_v23 = vpop.xlane.xlu0 %277 }
 0x1c9   :  { %v331_v24 = vsel %vm330_vm4, %v311_v16, %v329_v21  ;;  %v315_v25 = vrot.slane %v275_v22, %v751_v17  ;;  %v319_v26 = vrot.slane %v278_v23, %v751_v17 }
 0x1cb   :  { %v333_v27 = vsel %vm332_vm5, %v315_v25, %v331_v24 }
 0x1cc   :  { %v281_v28 = vpop.xlane.xlu1 %280  ;;  %v335_v30 = vsel %vm334_vm6, %v319_v26, %v333_v27  ;;  %v382_v31 = vpop.xlane.xlu0 %381 }
 0x1cd   :  { %v323_v29 = vrot.slane %v281_v28, %v751_v17 }
 0x1cf   :  { %v337_v32 = vsel %vm336_vm7, %v323_v29, %v335_v30 }
 0x1d0   :  { %339 = vxpose.xlu0.b32.start.end [1/1] (short) (narrow) %v337_v32, 8  ;;  %v392_v33 = vpop.xlane.xlu1 %391 }
 0x1d1   :  { %v394_v35 = vadd.f32 %v392_v33, %v382_v31 }
 0x1d3   :  { %v396_v36 = vadd.f32 %v395_v34, %v394_v35 }
 0x1d5   :  { %v443_v37 = vmul.f32 -1.442695, %v396_v36 }
 0x1d7   :  { %496 = vpow2.f32 %v443_v37 }
 0x1e1   :  { %v497_v38 = vpop.eup %496 }
 0x1e2   :  { %v400_v39 = vadd.f32 1.0, %v497_v38 }
 0x1e4   :  { %498 = vrcp.f32 %v400_v39 }
 0x1ee   :  { %v499_v40 = vpop.eup %498 }
 0x1ef   :  { %404 = vst.msk [vmem:[%s807_s9] sm:$0xff] %vm403_vm8, %v499_v40 }
 0x250   :  { %v355_v17 = vpop.trf.xlu0 }
 0x251   :  { %372 = vst.msk [vmem:[#allocation11] sm:$0xff] %vm371_vm9, %v355_v17 }
 0x252   :  { %599 = shalt.err (!%p596_p8)
}
 0x253   :  { %s600_s24 = scalar_lea.hbm %s806_s8, 128 }
 0x254   :  { %p601_p9 = scmp.ne.s32.totalorder %s806_s8, %s600_s24  ;;  %p604_p10 = scmp.lt.u32.totalorder %s600_s24, %s806_s8 }
 0x256   :  { %p606_p11 = pnand %p604_p10, %p601_p9 }
 0x258   :  { %609 = shalt.err (!%p606_p11)
}
 0x259   :  { %414 = dma.vmem_to_hbm [thread:$0]  %s412_s21, 128, %s806_s8, [#allocation5]  }
 0x25a   :  { %616 = dma.done.wait [#allocation5], 128  }
 0x25b   :  { %617 = vsyncadd [#allocation5], 4294967168 }
 0x25c   :  { %422 = vsyncpa [#allocation4], 1 }
 0x25d   :  { %423 = vsyncpa [#allocation7], 1 }
 0x25e   :  { %424 = vsyncpa [#allocation10], 1 }
 0x25f   :  { %425 = vsyncpa [#allocation5], 1 }

</bundles_post_ra>
